<compile_context>
chip_gen: v5e
topology: v5e:2x2
jax: 0.10.0
libtpu: 0.0.40
codegen_flags: <defaults>
</compile_context>

<pallas_src>
import functools

import jax
import jax.numpy as jnp
from jax.experimental import pallas as pl
from jax.experimental.pallas import tpu as pltpu


def _round_up(x, m):
    return (x + m - 1) // m * m


# ---------------------------------------------------------------------------
# Fused Pallas kernel: all GCN hops + stacking in one call.
# ---------------------------------------------------------------------------
def _fused_lightgcn_kernel(adj_ref, emb_ref, out_ref, agg_ref, *, tm, emb_dim, n_hops):
    """One grid step = one (hop, row-tile) of the fused LightGCN propagation.

    adj_ref : (tm, N_pad)              adjacency row tile (streamed, bf16/f32)
    emb_ref : (N_pad, D)               initial embeddings (resident, f32)
    out_ref : (N_pad, (n_hops+1)*D)    stacked hop embeddings (resident, f32)
    agg_ref : (2, N_pad, D) f32        ping-pong carried propagation state
    """
    h = pl.program_id(0)                      # hop index (sequential, outer)
    i = pl.program_id(1)                      # row-tile index within the hop
    row0 = pl.multiple_of(i * tm, tm)

    # One-time init: hop-0 slab of the output + slot 0 of the carried state.
    @pl.when(jnp.logical_and(h == 0, i == 0))
    def _init():
        e = emb_ref[...].astype(jnp.float32)
        out_ref[:, 0:emb_dim] = e
        agg_ref[0] = e

    slot = h % 2                              # previous-hop slot
    prev = agg_ref[slot]                      # (N_pad, D) f32, full prev-hop table
    adj_tile = adj_ref[...]                   # (tm, N_pad)

    # bf16 (or f32) operands on the MXU, f32 accumulation.
    nxt = jnp.dot(adj_tile, prev.astype(adj_tile.dtype),
                  preferred_element_type=jnp.float32)        # (tm, D) f32

    # Carry the new hop's rows for the next hop.
    agg_ref[1 - slot, pl.ds(row0, tm), :] = nxt

    # Static unroll over hop values so every store into the resident lane-dense
    # output slab has a static lane offset.
    for hh in range(n_hops):
        @pl.when(h == hh)
        def _write(hh=hh, nxt=nxt):
            c0 = (hh + 1) * emb_dim
            out_ref[pl.ds(row0, tm), c0:c0 + emb_dim] = nxt.astype(out_ref.dtype)


def _lightgcn_pallas(adj, emb, *, n_hops, tm):
    """adj: (N_pad, N_pad) [bf16/f32], emb: (N_pad, D) f32 -> (N_pad, (n_hops+1)*D) f32."""
    N_pad, D = emb.shape
    assert adj.shape == (N_pad, N_pad)
    assert N_pad % tm == 0 and N_pad % 128 == 0 and tm % 128 == 0

    n_tiles = N_pad // tm
    out_width = (n_hops + 1) * D

    cost = pl.CostEstimate(
        flops=2 * n_hops * N_pad * N_pad * D,
        transcendentals=0,
        bytes_accessed=(n_hops * N_pad * N_pad * adj.dtype.itemsize
                        + N_pad * D * emb.dtype.itemsize
                        + N_pad * out_width * 4),
    )

    kernel = functools.partial(_fused_lightgcn_kernel,
                               tm=tm, emb_dim=D, n_hops=n_hops)

    return pl.pallas_call(
        kernel,
        out_shape=jax.ShapeDtypeStruct((N_pad, out_width), jnp.float32),
        grid_spec=pltpu.PrefetchScalarGridSpec(
            num_scalar_prefetch=0,
            grid=(n_hops, n_tiles),
            in_specs=[
                # Adjacency row tile, streamed / double-buffered by Pallas.
                pl.BlockSpec((tm, N_pad), lambda h, i: (i, 0)),
                # Initial embeddings, constant block -> fetched once, resident.
                pl.BlockSpec((N_pad, D), lambda h, i: (0, 0)),
            ],
            # Constant block index -> output slab resident in VMEM for the whole
            # grid, written back to HBM once (lane-dense (hops+1)*D columns).
            out_specs=pl.BlockSpec((N_pad, out_width), lambda h, i: (0, 0)),
            scratch_shapes=[pltpu.VMEM((2, N_pad, D), jnp.float32)],
        ),
        compiler_params=pltpu.CompilerParams(
            # Both axes carry state (hop sequentially, rows through the shared
            # scratch), so neither may be megacore-sharded.
            dimension_semantics=("arbitrary", "arbitrary"),
            # Note: for large N raise vmem_limit_bytes and/or tile the
            # contraction dimension instead of keeping (N, D) resident.
        ),
        cost_estimate=cost,
    )(adj, emb)


# ---------------------------------------------------------------------------
# LightGCN forward (padding/casting glue in JAX, hot path in the fused kernel).
# ---------------------------------------------------------------------------
@functools.partial(jax.jit,
                   static_argnames=("n_users", "context_hops", "tm", "adj_dtype"))
def lightgcn_forward(user_emb, item_emb, norm_adj, *, n_users, context_hops,
                     tm=256, adj_dtype=jnp.bfloat16):
    assert context_hops >= 1
    assert tm % 128 == 0
    all_embed = jnp.concatenate([user_emb, item_emb], axis=0).astype(jnp.float32)
    N, D = all_embed.shape

    # Pad N to a 128-lane / row-tile aligned size; clamp the row tile to N.
    n_pad128 = _round_up(N, 128)
    tm_eff = min(tm, n_pad128)
    N_pad = _round_up(N, tm_eff)

    adj_c = norm_adj.astype(adj_dtype)
    if N_pad == N:
        adj_p = adj_c
        emb_p = all_embed
    else:
        adj_p = jnp.zeros((N_pad, N_pad), adj_dtype).at[:N, :N].set(adj_c)
        emb_p = jnp.zeros((N_pad, D), jnp.float32).at[:N].set(all_embed)

    stacked = _lightgcn_pallas(adj_p, emb_p, n_hops=context_hops, tm=tm_eff)
    embs = stacked[:N].reshape(N, context_hops + 1, D)      # free, contiguous
    return embs[:n_users], embs[n_users:]


# ---------------------------------------------------------------------------
# Deterministic parameter / adjacency construction.
# ---------------------------------------------------------------------------
def xavier_uniform(key, shape, dtype=jnp.float32):
    fan_in, fan_out = shape[0], shape[1]
    bound = (6.0 / (fan_in + fan_out)) ** 0.5
    return jax.random.uniform(key, shape, dtype, minval=-bound, maxval=bound)


def build_norm_adj(key, n_users, n_items, density=0.1, dtype=jnp.float32):
    """Symmetric-normalized bipartite adjacency D^-1/2 A D^-1/2 as dense (N, N)."""
    N = n_users + n_items
    r = jax.random.uniform(key, (n_users, n_items))
    inter = (r < density).astype(dtype)                      # user-item interactions
    adj = jnp.zeros((N, N), dtype)
    adj = adj.at[:n_users, n_users:].set(inter)
    adj = adj.at[n_users:, :n_users].set(inter.T)
    deg = jnp.maximum(adj.sum(axis=1), 1.0)
    d_inv_sqrt = 1.0 / jnp.sqrt(deg)
    return adj * d_inv_sqrt[:, None] * d_inv_sqrt[None, :]


if __name__ == "__main__":
    # Small deterministic config (mess_dropout / edge_dropout disabled).
    config = dict(
        n_users=48,
        n_items=80,
        emb_dim=64,
        context_hops=3,
        pool="mean",
        mess_dropout=False,
        edge_dropout=False,
    )
    n_users, n_items = config["n_users"], config["n_items"]
    emb_dim, hops = config["emb_dim"], config["context_hops"]

    key = jax.random.PRNGKey(0)
    k_u, k_i, k_a = jax.random.split(key, 3)
    user_emb = xavier_uniform(k_u, (n_users, emb_dim))
    item_emb = xavier_uniform(k_i, (n_items, emb_dim))
    norm_adj = build_norm_adj(k_a, n_users, n_items)

    user_gcn_emb, item_gcn_emb = lightgcn_forward(
        user_emb, item_emb, norm_adj, n_users=n_users, context_hops=hops)
    user_gcn_emb = jax.block_until_ready(user_gcn_emb)
    item_gcn_emb = jax.block_until_ready(item_gcn_emb)

    # Shape checks.
    assert user_gcn_emb.shape == (n_users, hops + 1, emb_dim)
    assert item_gcn_emb.shape == (n_items, hops + 1, emb_dim)
    got = jnp.concatenate([user_gcn_emb, item_gcn_emb], axis=0)

    all_embed = jnp.concatenate([user_emb, item_emb], axis=0)

    # (a) Reference matching the kernel's numerics: bf16 adjacency / bf16
    #     operands, f32 accumulation, f32 hop-to-hop carry.
    adj_bf16 = norm_adj.astype(jnp.bfloat16)
    agg = all_embed
    ref_b = [all_embed]
    for _ in range(hops):
        agg = jnp.dot(adj_bf16, agg.astype(jnp.bfloat16),
                      preferred_element_type=jnp.float32)
        ref_b.append(agg)
    ref_bf16 = jnp.stack(ref_b, axis=1)
    assert jnp.allclose(got, ref_bf16, atol=1e-2, rtol=1e-2)

    # (b) Pure-f32 reference (original module semantics); loose tolerance since
    #     the kernel uses a bf16 adjacency with f32 accumulation.
    agg = all_embed
    ref_f = [all_embed]
    for _ in range(hops):
        agg = norm_adj @ agg
        ref_f.append(agg)
    ref_f32 = jnp.stack(ref_f, axis=1)
    assert jnp.allclose(got, ref_f32, atol=5e-2, rtol=5e-2)

    print("KERNEL_OK")
</pallas_src>

<mosaic_0001>
module attributes {stable_mosaic.version = 11 : i64} {
  func.func @_fused_lightgcn_kernel(%arg0: i32, %arg1: i32, %arg2: memref<128x128xbf16, #tpu.memory_space<vmem>>, %arg3: memref<128x64xf32, #tpu.memory_space<vmem>>, %arg4: memref<128x256xf32, #tpu.memory_space<vmem>>, %arg5: memref<2x128x64xf32, #tpu.memory_space<vmem>>) attributes {dimension_semantics = [#tpu.dimension_semantics<arbitrary>, #tpu.dimension_semantics<arbitrary>], iteration_bounds = array<i64: 3, 1>, scalar_prefetch = 0 : i64, scratch_operands = 1 : i64, tpu.core_type = #tpu.core_type<tc>, window_params = [{transform_indices = @transform_0, window_bounds = array<i64: 128, 128>}, {pipeline_mode = #tpu.pipeline_mode<synchronous>, transform_indices = @transform_1, window_bounds = array<i64: 128, 64>}, {pipeline_mode = #tpu.pipeline_mode<synchronous>, transform_indices = @transform_2, window_bounds = array<i64: 128, 256>}]} {
    %c128_i32 = arith.constant 128 : i32
    %0 = arith.muli %arg1, %c128_i32 : i32
    %1 = tpu.assume_multiple %0, 128 : i32
    %c0_i32 = arith.constant 0 : i32
    %2 = arith.cmpi eq, %arg0, %c0_i32 : i32
    %c0_i32_0 = arith.constant 0 : i32
    %3 = arith.cmpi eq, %arg1, %c0_i32_0 : i32
    %4 = arith.andi %2, %3 : i1
    %5 = arith.extui %4 : i1 to i32
    %c0_i32_1 = arith.constant 0 : i32
    %6 = arith.cmpi ne, %5, %c0_i32_1 : i32
    scf.if %6 {
      %c0_17 = arith.constant 0 : index
      %c0_18 = arith.constant 0 : index
      %38 = vector.load %arg3[%c0_17, %c0_18] : memref<128x64xf32, #tpu.memory_space<vmem>>, vector<128x64xf32>
      %c0_19 = arith.constant 0 : index
      %c0_20 = arith.constant 0 : index
      %39 = vector.load %arg4[%c0_19, %c0_20] : memref<128x256xf32, #tpu.memory_space<vmem>>, vector<128x64xf32>
      tpu.vector_store %arg4[%c0_19, %c0_20], %38 {strides = array<i32>} : memref<128x256xf32, #tpu.memory_space<vmem>>, vector<128x64xf32>,
      %c0_21 = arith.constant 0 : index
      %c0_22 = arith.constant 0 : index
      %c0_23 = arith.constant 0 : index
      %40 = vector.load %arg5[%c0_21, %c0_22, %c0_23] : memref<2x128x64xf32, #tpu.memory_space<vmem>>, vector<1x128x64xf32>
      %41 = vector.shape_cast %40 : vector<1x128x64xf32> to vector<128x64xf32>
      %42 = vector.shape_cast %38 : vector<128x64xf32> to vector<1x128x64xf32>
      tpu.vector_store %arg5[%c0_21, %c0_22, %c0_23], %42 {strides = array<i32>} : memref<2x128x64xf32, #tpu.memory_space<vmem>>, vector<1x128x64xf32>,
    } else {
    }
    %c2_i32 = arith.constant 2 : i32
    %c0_i32_2 = arith.constant 0 : i32
    %7 = arith.cmpi eq, %c2_i32, %c0_i32_2 : i32
    %c1_i32 = arith.constant 1 : i32
    %8 = arith.select %7, %c1_i32, %c2_i32 : i32
    %9 = arith.remsi %arg0, %8 : i32
    %c0_i32_3 = arith.constant 0 : i32
    %10 = arith.cmpi ne, %9, %c0_i32_3 : i32
    %c0_i32_4 = arith.constant 0 : i32
    %11 = arith.cmpi slt, %9, %c0_i32_4 : i32
    %c0_i32_5 = arith.constant 0 : i32
    %12 = arith.cmpi slt, %8, %c0_i32_5 : i32
    %13 = arith.xori %11, %12 : i1
    %14 = arith.andi %13, %10 : i1
    %15 = arith.addi %9, %8 : i32
    %16 = arith.select %14, %15, %9 : i32
    %17 = arith.index_cast %16 : i32 to index
    %c0 = arith.constant 0 : index
    %c0_6 = arith.constant 0 : index
    %18 = vector.load %arg5[%17, %c0, %c0_6] : memref<2x128x64xf32, #tpu.memory_space<vmem>>, vector<1x128x64xf32>
    %19 = vector.shape_cast %18 : vector<1x128x64xf32> to vector<128x64xf32>
    %c0_7 = arith.constant 0 : index
    %c0_8 = arith.constant 0 : index
    %20 = vector.load %arg2[%c0_7, %c0_8] : memref<128x128xbf16, #tpu.memory_space<vmem>>, vector<128x128xbf16>
    %21 = arith.truncf %19 : vector<128x64xf32> to vector<128x64xbf16>
    %cst = arith.constant dense<0.000000e+00> : vector<128x64xf32>
    %22 = tpu.matmul %20, %21, %cst {dimension_numbers = #tpu.dot_dimension_numbers<[1], [0], [0], [1], [0, 0, 1, 1], [], []>} : vector<128x128xbf16>, vector<128x64xbf16>, vector<128x64xf32> -> vector<128x64xf32>
    %c1_i32_9 = arith.constant 1 : i32
    %23 = arith.subi %c1_i32_9, %16 : i32
    %24 = arith.index_cast %23 : i32 to index
    %25 = arith.index_cast %1 : i32 to index
    %c0_10 = arith.constant 0 : index
    %26 = vector.load %arg5[%24, %25, %c0_10] : memref<2x128x64xf32, #tpu.memory_space<vmem>>, vector<1x128x64xf32>
    %27 = vector.shape_cast %26 : vector<1x128x64xf32> to vector<128x64xf32>
    %28 = vector.shape_cast %22 : vector<128x64xf32> to vector<1x128x64xf32>
    tpu.vector_store %arg5[%24, %25, %c0_10], %28 {strides = array<i32>} : memref<2x128x64xf32, #tpu.memory_space<vmem>>, vector<1x128x64xf32>,
    %c0_i32_11 = arith.constant 0 : i32
    %29 = arith.cmpi eq, %arg0, %c0_i32_11 : i32
    %30 = arith.extui %29 : i1 to i32
    %c0_i32_12 = arith.constant 0 : i32
    %31 = arith.cmpi ne, %30, %c0_i32_12 : i32
    scf.if %31 {
      %38 = arith.index_cast %1 : i32 to index
      %c64 = arith.constant 64 : index
      %39 = vector.load %arg4[%38, %c64] : memref<128x256xf32, #tpu.memory_space<vmem>>, vector<128x64xf32>
      tpu.vector_store %arg4[%38, %c64], %22 {strides = array<i32>} : memref<128x256xf32, #tpu.memory_space<vmem>>, vector<128x64xf32>,
    } else {
    }
    %c1_i32_13 = arith.constant 1 : i32
    %32 = arith.cmpi eq, %arg0, %c1_i32_13 : i32
    %33 = arith.extui %32 : i1 to i32
    %c0_i32_14 = arith.constant 0 : i32
    %34 = arith.cmpi ne, %33, %c0_i32_14 : i32
    scf.if %34 {
      %38 = arith.index_cast %1 : i32 to index
      %c128 = arith.constant 128 : index
      %39 = vector.load %arg4[%38, %c128] : memref<128x256xf32, #tpu.memory_space<vmem>>, vector<128x64xf32>
      tpu.vector_store %arg4[%38, %c128], %22 {strides = array<i32>} : memref<128x256xf32, #tpu.memory_space<vmem>>, vector<128x64xf32>,
    } else {
    }
    %c2_i32_15 = arith.constant 2 : i32
    %35 = arith.cmpi eq, %arg0, %c2_i32_15 : i32
    %36 = arith.extui %35 : i1 to i32
    %c0_i32_16 = arith.constant 0 : i32
    %37 = arith.cmpi ne, %36, %c0_i32_16 : i32
    scf.if %37 {
      %38 = arith.index_cast %1 : i32 to index
      %c192 = arith.constant 192 : index
      %39 = vector.load %arg4[%38, %c192] : memref<128x256xf32, #tpu.memory_space<vmem>>, vector<128x64xf32>
      tpu.vector_store %arg4[%38, %c192], %22 {strides = array<i32>} : memref<128x256xf32, #tpu.memory_space<vmem>>, vector<128x64xf32>,
    } else {
    }
    return
  }
  func.func @transform_0(%arg0: i32, %arg1: i32) -> (i32, i32) {
    %c0_i32 = arith.constant 0 : i32
    %c0_i32_0 = arith.constant 0 : i32
    return %arg1, %c0_i32 : i32, i32
  }
  func.func @transform_1(%arg0: i32, %arg1: i32) -> (i32, i32) {
    %c0_i32 = arith.constant 0 : i32
    %c0_i32_0 = arith.constant 0 : i32
    %c0_i32_1 = arith.constant 0 : i32
    return %c0_i32, %c0_i32_0 : i32, i32
  }
  func.func @transform_2(%arg0: i32, %arg1: i32) -> (i32, i32) {
    %c0_i32 = arith.constant 0 : i32
    %c0_i32_0 = arith.constant 0 : i32
    %c0_i32_1 = arith.constant 0 : i32
    return %c0_i32, %c0_i32_0 : i32, i32
  }
}

</mosaic_0001>

<bundles_post_ra>
// kernel: lightgcn_forward.1
= control target key start
LH: loop header
LB: loop body
LE: loop exit
PB: predicated region body
PF: predicated region fallthrough
CT: control target
= control target key end

     0   :  { %s774_s9 = smov 0   ;;  %s776_s10 = smov 0   ;;  %s1288_s0 = inlined_call_operand.vmem [shape: bf16[128,128], index: 0, kind: input, shape index: {}]   ;;  %s1289_s1 = inlined_call_operand.vmem [shape: f32[128,64], index: 1, kind: input, shape index: {}]   ;;  %s1290_s2 = inlined_call_operand.vmem [shape: f32[128,256], index: 2, kind: output, shape index: {}]  }
   0x1   :  { %s778_s11 = smov 0  }
   0x2 LB: > { %s24_s12 = sadd.s32 1, %s751_s10  ;;  %p630_p0 = scmp.ge.s32.totalorder %s755_s11, 1  ;;  %s755_s11 = sphi %s778_s11, %s12_s11   ;;  %s751_s10 = sphi %s776_s10, %s1292_s10   ;;  %s747_s9 = sphi %s774_s9, %s1291_s9  }
   0x3   : > { %p26_p1 = scmp.ge.s32.totalorder %s24_s12, 3  ;;  %p120_p2 = scmp.lt.s32.totalorder %s755_s11, 4 }
   0x5   : > { %s1294_s12 = smov (%p26_p1, %s24_s12), 0  ;;  %p121_p3 = pnand %p630_p0, %p120_p2 }
   0x6   : > { %p144_p4 = scmp.eq.s32.totalorder (!%p121_p3), %s747_s9, 0 }
   0x7   : > { %124 = sbr.rel (%p121_p3) target bundleno = 590 (0x24e), region = 28 }
   0xc   : > { %149 = sbr.rel (!%p144_p4) target bundleno = 45 (0x2d), region = 32  ;;  %v150_v0 = vld [vmem:[%s1289_s1] sm:$0xff] (%p144_p4)  ;;  %vm166_vm0 = vcmask (%p144_p4), 523264   ;;  %v151_v1 = vld [vmem:[%s1289_s1 + $0x8] sm:$0xff] (%p144_p4)  ;;  %v152_v2 = vld [vmem:[%s1289_s1 + $0x10] sm:$0xff] (%p144_p4) }
   0xd   : > { %167 = vst.msk [vmem:[%s1290_s2] sm:$0xff] (%p144_p4), %vm166_vm0, %v150_v0  ;;  %v153_v3 = vld [vmem:[%s1289_s1 + $0x18] sm:$0xff] (%p144_p4)  ;;  %v154_v4 = vld [vmem:[%s1289_s1 + $0x20] sm:$0xff] (%p144_p4)  ;;  %v155_v5 = vld [vmem:[%s1289_s1 + $0x28] sm:$0xff] (%p144_p4) }
   0xe   : > { %183 = vst.msk [vmem:[#allocation2] sm:$0xff] (%p144_p4), %vm166_vm0, %v150_v0  ;;  %v156_v6 = vld [vmem:[%s1289_s1 + $0x30] sm:$0xff] (%p144_p4)  ;;  %v157_v7 = vld [vmem:[%s1289_s1 + $0x38] sm:$0xff] (%p144_p4)  ;;  %v158_v8 = vld [vmem:[%s1289_s1 + $0x40] sm:$0xff] (%p144_p4) }
   0xf   : > { %168 = vst.msk [vmem:[%s1290_s2 + $0x10] sm:$0xff] (%p144_p4), %vm166_vm0, %v151_v1  ;;  %v159_v9 = vld [vmem:[%s1289_s1 + $0x48] sm:$0xff] (%p144_p4)  ;;  %v160_v10 = vld [vmem:[%s1289_s1 + $0x50] sm:$0xff] (%p144_p4)  ;;  %v161_v11 = vld [vmem:[%s1289_s1 + $0x58] sm:$0xff] (%p144_p4) }
  0x10   : > { %184 = vst.msk [vmem:[#allocation2 + $0x8] sm:$0xff] (%p144_p4), %vm166_vm0, %v151_v1  ;;  %v162_v12 = vld [vmem:[%s1289_s1 + $0x60] sm:$0xff] (%p144_p4)  ;;  %v163_v13 = vld [vmem:[%s1289_s1 + $0x68] sm:$0xff] (%p144_p4)  ;;  %v164_v14 = vld [vmem:[%s1289_s1 + $0x70] sm:$0xff] (%p144_p4) }
  0x11   : > { %169 = vst.msk [vmem:[%s1290_s2 + $0x20] sm:$0xff] %vm166_vm0, %v152_v2  ;;  %v165_v15 = vld [vmem:[%s1289_s1 + $0x78] sm:$0xff] }
  0x12   : > { %185 = vst.msk [vmem:[#allocation2 + $0x10] sm:$0xff] %vm166_vm0, %v152_v2 }
  0x13   : > { %170 = vst.msk [vmem:[%s1290_s2 + $0x30] sm:$0xff] %vm166_vm0, %v153_v3 }
  0x14   : > { %186 = vst.msk [vmem:[#allocation2 + $0x18] sm:$0xff] %vm166_vm0, %v153_v3 }
  0x15   : > { %171 = vst.msk [vmem:[%s1290_s2 + $0x40] sm:$0xff] %vm166_vm0, %v154_v4 }
  0x16   : > { %187 = vst.msk [vmem:[#allocation2 + $0x20] sm:$0xff] %vm166_vm0, %v154_v4 }
  0x17   : > { %172 = vst.msk [vmem:[%s1290_s2 + $0x50] sm:$0xff] %vm166_vm0, %v155_v5 }
  0x18   : > { %188 = vst.msk [vmem:[#allocation2 + $0x28] sm:$0xff] %vm166_vm0, %v155_v5 }
  0x19   : > { %173 = vst.msk [vmem:[%s1290_s2 + $0x60] sm:$0xff] %vm166_vm0, %v156_v6 }
  0x1a   : > { %189 = vst.msk [vmem:[#allocation2 + $0x30] sm:$0xff] %vm166_vm0, %v156_v6 }
  0x1b   : > { %174 = vst.msk [vmem:[%s1290_s2 + $0x70] sm:$0xff] %vm166_vm0, %v157_v7 }
  0x1c   : > { %190 = vst.msk [vmem:[#allocation2 + $0x38] sm:$0xff] %vm166_vm0, %v157_v7 }
  0x1d   : > { %175 = vst.msk [vmem:[%s1290_s2 + $0x80] sm:$0xff] %vm166_vm0, %v158_v8 }
  0x1e   : > { %191 = vst.msk [vmem:[#allocation2 + $0x40] sm:$0xff] %vm166_vm0, %v158_v8 }
  0x1f   : > { %176 = vst.msk [vmem:[%s1290_s2 + $0x90] sm:$0xff] %vm166_vm0, %v159_v9 }
  0x20   : > { %192 = vst.msk [vmem:[#allocation2 + $0x48] sm:$0xff] %vm166_vm0, %v159_v9 }
  0x21   : > { %177 = vst.msk [vmem:[%s1290_s2 + $0xa0] sm:$0xff] %vm166_vm0, %v160_v10 }
  0x22   : > { %193 = vst.msk [vmem:[#allocation2 + $0x50] sm:$0xff] %vm166_vm0, %v160_v10 }
  0x23   : > { %178 = vst.msk [vmem:[%s1290_s2 + $0xb0] sm:$0xff] %vm166_vm0, %v161_v11 }
  0x24   : > { %194 = vst.msk [vmem:[#allocation2 + $0x58] sm:$0xff] %vm166_vm0, %v161_v11 }
  0x25   : > { %179 = vst.msk [vmem:[%s1290_s2 + $0xc0] sm:$0xff] %vm166_vm0, %v162_v12 }
  0x26   : > { %195 = vst.msk [vmem:[#allocation2 + $0x60] sm:$0xff] %vm166_vm0, %v162_v12 }
  0x27   : > { %180 = vst.msk [vmem:[%s1290_s2 + $0xd0] sm:$0xff] %vm166_vm0, %v163_v13 }
  0x28   : > { %196 = vst.msk [vmem:[#allocation2 + $0x68] sm:$0xff] %vm166_vm0, %v163_v13 }
  0x29   : > { %181 = vst.msk [vmem:[%s1290_s2 + $0xe0] sm:$0xff] %vm166_vm0, %v164_v14 }
  0x2a   : > { %197 = vst.msk [vmem:[#allocation2 + $0x70] sm:$0xff] %vm166_vm0, %v164_v14 }
  0x2b   : > { %182 = vst.msk [vmem:[%s1290_s2 + $0xf0] sm:$0xff] %vm166_vm0, %v165_v15 }
  0x2c   : > { %198 = vst.msk [vmem:[#allocation2 + $0x78] sm:$0xff] %vm166_vm0, %v165_v15 }
  0x2d PF: > { %p199_p5 = scmp.lt.s32.totalorder %s747_s9, 0  ;;  %s200_s29 = ssub.s32 0, %s747_s9  ;;  %v675_v40 = vld [vmem:[%s1288_s0] sm:$0xff]  ;;  %v677_v41 = vld [vmem:[%s1288_s0 + $0x10] sm:$0xff]  ;;  %v676_v44 = vld [vmem:[%s1288_s0 + $0x8] sm:$0xff]  ;;  %vm354_vm1 = vcmask 523264  }
  0x2e   : > { %s632_s30 = smin.u32 %s747_s9, %s200_s29  ;;  %v679_v42 = vld [vmem:[%s1288_s0 + $0x20] sm:$0xff]  ;;  %v681_v43 = vld [vmem:[%s1288_s0 + $0x30] sm:$0xff]  ;;  %v678_v45 = vld [vmem:[%s1288_s0 + $0x18] sm:$0xff]  ;;  %p669_p7 = scmp.ne.s32.totalorder %s747_s9, 0 }
  0x2f   : > { %s202_s3 = sand.u32 1, %s632_s30   ;;  %v680_v46 = vld [vmem:[%s1288_s0 + $0x28] sm:$0xff]  ;;  %v682_v47 = vld [vmem:[%s1288_s0 + $0x38] sm:$0xff] }
  0x30   : > { %s203_s4 = ssub.s32 0, %s202_s3 }
  0x31   : > { %s1296_s4 = smov (!%p199_p5, %s203_s4), %s202_s3  ;;  %s757_s3 = smov (!%p669_p7), 64  }
  0x32   : > { %p634_p6 = scmp.lt.s32.totalorder %s1296_s4, 0  ;;  %s209_s5 = sadd.s32 2, %s1296_s4 }
  0x34   : > { %s1298_s5 = smov (!%p634_p6, %s209_s5), %s1296_s4 }
  0x35   : > { %s635_s6 = sshll.u32 %s1298_s5, 7  ;;  %s350_s28 = ssub.s32 1, %s1298_s5 }
  0x36   : > { %s929_s7 = scalar_lea.vmem [#allocation2], %s635_s6  ;;  %s668_s29 = sshll.u32 %s350_s28, 7 }
  0x37   : > { %v227_v16 = vld [vmem:[%s929_s7 + $0x70] sm:$0xff]  ;;  %v228_v17 = vld [vmem:[%s929_s7 + $0x78] sm:$0xff]  ;;  %v225_v18 = vld [vmem:[%s929_s7 + $0x60] sm:$0xff]  ;;  %s353_s30 = scalar_lea.vmem [#allocation2], %s668_s29 }
  0x38   : > { %v252_v19 = vpack.c.bf16 %v228_v17, %v227_v16  ;;  %v226_v20 = vld [vmem:[%s929_s7 + $0x68] sm:$0xff]  ;;  %v223_v22 = vld [vmem:[%s929_s7 + $0x50] sm:$0xff]  ;;  %v224_v23 = vld [vmem:[%s929_s7 + $0x58] sm:$0xff] }
  0x39   : > { %v251_v21 = vpack.c.bf16 %v226_v20, %v225_v18  ;;  %v250_v24 = vpack.c.bf16 %v224_v23, %v223_v22  ;;  %v221_v25 = vld [vmem:[%s929_s7 + $0x40] sm:$0xff]  ;;  %v222_v26 = vld [vmem:[%s929_s7 + $0x48] sm:$0xff]  ;;  %v219_v28 = vld [vmem:[%s929_s7 + $0x30] sm:$0xff] }
  0x3a   : > { %301 = vmatpush.bf16.msra.mxu0 %v252_v19  ;;  %683 = vmatpush.bf16.msra.mxu1 %v252_v19  ;;  %v249_v27 = vpack.c.bf16 %v222_v26, %v221_v25  ;;  %v220_v29 = vld [vmem:[%s929_s7 + $0x38] sm:$0xff]  ;;  %v217_v31 = vld [vmem:[%s929_s7 + $0x20] sm:$0xff]  ;;  %v218_v32 = vld [vmem:[%s929_s7 + $0x28] sm:$0xff] }
  0x3b   : > { %684 = vmatpush.bf16.msra.mxu2 %v252_v19  ;;  %685 = vmatpush.bf16.msra.mxu3 %v252_v19  ;;  %v248_v30 = vpack.c.bf16 %v220_v29, %v219_v28  ;;  %v247_v33 = vpack.c.bf16 %v218_v32, %v217_v31  ;;  %v215_v34 = vld [vmem:[%s929_s7 + $0x10] sm:$0xff]  ;;  %v216_v35 = vld [vmem:[%s929_s7 + $0x18] sm:$0xff]  ;;  %v213_v37 = vld [vmem:[%s929_s7] sm:$0xff] }
  0x3c   : > { %v246_v36 = vpack.c.bf16 %v216_v35, %v215_v34  ;;  %v214_v38 = vld [vmem:[%s929_s7 + $0x8] sm:$0xff] }
  0x3d   : > { %v245_v39 = vpack.c.bf16 %v214_v38, %v213_v37 }
  0x3e   : > { %302 = vmatpush.bf16.msra.mxu0 %v251_v21  ;;  %686 = vmatpush.bf16.msra.mxu1 %v251_v21 }
  0x3f   : > { %687 = vmatpush.bf16.msra.mxu2 %v251_v21  ;;  %688 = vmatpush.bf16.msra.mxu3 %v251_v21 }
  0x42   : > { %303 = vmatpush.bf16.msra.mxu0 %v250_v24  ;;  %689 = vmatpush.bf16.msra.mxu1 %v250_v24 }
  0x43   : > { %690 = vmatpush.bf16.msra.mxu2 %v250_v24  ;;  %691 = vmatpush.bf16.msra.mxu3 %v250_v24 }
  0x46   : > { %304 = vmatpush.bf16.msra.mxu0 %v249_v27  ;;  %692 = vmatpush.bf16.msra.mxu1 %v249_v27 }
  0x47   : > { %693 = vmatpush.bf16.msra.mxu2 %v249_v27  ;;  %694 = vmatpush.bf16.msra.mxu3 %v249_v27 }
  0x4a   : > { %305 = vmatpush.bf16.msra.mxu0 %v248_v30  ;;  %695 = vmatpush.bf16.msra.mxu1 %v248_v30 }
  0x4b   : > { %696 = vmatpush.bf16.msra.mxu2 %v248_v30  ;;  %697 = vmatpush.bf16.msra.mxu3 %v248_v30 }
  0x4e   : > { %306 = vmatpush.bf16.msra.mxu0 %v247_v33  ;;  %698 = vmatpush.bf16.msra.mxu1 %v247_v33 }
  0x4f   : > { %699 = vmatpush.bf16.msra.mxu2 %v247_v33  ;;  %700 = vmatpush.bf16.msra.mxu3 %v247_v33 }
  0x52   : > { %307 = vmatpush.bf16.msra.mxu0 %v246_v36  ;;  %701 = vmatpush.bf16.msra.mxu1 %v246_v36 }
  0x53   : > { %702 = vmatpush.bf16.msra.mxu2 %v246_v36  ;;  %703 = vmatpush.bf16.msra.mxu3 %v246_v36 }
  0x56   : > { %308 = vmatpush.bf16.msra.mxu0 %v245_v39  ;;  %704 = vmatpush.bf16.msra.mxu1 %v245_v39 }
  0x57   : > { %705 = vmatpush.bf16.msra.mxu2 %v245_v39  ;;  %706 = vmatpush.bf16.msra.mxu3 %v245_v39 }
  0x59   : > { %309 = vmatmul.bf16.vlgmr.msra.gmra.mxu0 %v675_v40  ;;  %319 = vmatmul.bf16.vlgmr.msra.gmra.mxu1 %v677_v41 }
  0x5a   : > { %329 = vmatmul.bf16.vlgmr.msra.gmra.mxu2 %v679_v42  ;;  %339 = vmatmul.bf16.vlgmr.msra.gmra.mxu3 %v681_v43 }
  0x69   : > { %314 = vmatmul.bf16.gmra.mxu0 %v676_v44  ;;  %324 = vmatmul.bf16.gmra.mxu1 %v678_v45 }
  0x6a   : > { %334 = vmatmul.bf16.gmra.mxu2 %v680_v46  ;;  %344 = vmatmul.bf16.gmra.mxu3 %v682_v47 }
  0xd6   : > { %v972_v48 = vpop.f32.mrf.mxu0  ;;  %v974_v49 = vpop.f32.mrf.mxu1 }
  0xd7   : > { %355 = vst.msk [vmem:[%s353_s30] sm:$0xff] %vm354_vm1, %v972_v48 }
  0xd8   : > { %359 = vst.msk [vmem:[%s353_s30 + $0x20] sm:$0xff] %vm354_vm1, %v974_v49 }
  0xdd   : > { %v980_v50 = vpop.f32.mrf.mxu2  ;;  %v982_v51 = vpop.f32.mrf.mxu3 }
  0xde   : > { %363 = vst.msk [vmem:[%s353_s30 + $0x40] sm:$0xff] %vm354_vm1, %v980_v50  ;;  %v986_v52 = vpop.f32.mrf.mxu0  ;;  %v988_v53 = vpop.f32.mrf.mxu1 }
  0xdf   : > { %367 = vst.msk [vmem:[%s353_s30 + $0x60] sm:$0xff] %vm354_vm1, %v982_v51 }
  0xe0   : > { %356 = vst.msk [vmem:[%s353_s30 + $0x8] sm:$0xff] %vm354_vm1, %v986_v52 }
  0xe1   : > { %360 = vst.msk [vmem:[%s353_s30 + $0x28] sm:$0xff] %vm354_vm1, %v988_v53 }
  0xe5   : > { %v996_v54 = vpop.f32.mrf.mxu2  ;;  %v998_v55 = vpop.f32.mrf.mxu3 }
  0xe6   : > { %364 = vst.msk [vmem:[%s353_s30 + $0x48] sm:$0xff] %vm354_vm1, %v996_v54  ;;  %v1002_v56 = vpop.f32.mrf.mxu0  ;;  %v1004_v57 = vpop.f32.mrf.mxu1 }
  0xe7   : > { %368 = vst.msk [vmem:[%s353_s30 + $0x68] sm:$0xff] %vm354_vm1, %v998_v55 }
  0xe8   : > { %357 = vst.msk [vmem:[%s353_s30 + $0x10] sm:$0xff] %vm354_vm1, %v1002_v56 }
  0xe9   : > { %361 = vst.msk [vmem:[%s353_s30 + $0x30] sm:$0xff] %vm354_vm1, %v1004_v57 }
  0xed   : > { %v1012_v58 = vpop.f32.mrf.mxu2  ;;  %v1014_v59 = vpop.f32.mrf.mxu3 }
  0xee   : > { %365 = vst.msk [vmem:[%s353_s30 + $0x50] sm:$0xff] %vm354_vm1, %v1012_v58  ;;  %v1018_v60 = vpop.f32.mrf.mxu0  ;;  %v1020_v61 = vpop.f32.mrf.mxu1 }
  0xef   : > { %369 = vst.msk [vmem:[%s353_s30 + $0x70] sm:$0xff] %vm354_vm1, %v1014_v59 }
  0xf0   : > { %358 = vst.msk [vmem:[%s353_s30 + $0x18] sm:$0xff] %vm354_vm1, %v1018_v60 }
  0xf1   : > { %362 = vst.msk [vmem:[%s353_s30 + $0x38] sm:$0xff] %vm354_vm1, %v1020_v61 }
  0xf3   : > { %373 = sbr.rel (%p669_p7) target bundleno = 404 (0x194), region = 36 }
  0xf5   : > { %v1028_v62 = vpop.f32.mrf.mxu2  ;;  %v1030_v63 = vpop.f32.mrf.mxu3 }
  0xf6   : > { %366 = vst.msk [vmem:[%s353_s30 + $0x58] sm:$0xff] %vm354_vm1, %v1028_v62 }
  0xf7   : > { %370 = vst.msk [vmem:[%s353_s30 + $0x78] sm:$0xff] %vm354_vm1, %v1030_v63 }
  0xf8   : > { %390 = vrot.lane.b32.xlu0 %v972_v48, %s757_s3  ;;  %394 = vrot.lane.b32.xlu1 %v1002_v56, %s757_s3  ;;  %vm443_vm2 = vcmask 1048064  }
  0xf9   : > { %398 = vrot.lane.b32.xlu2 %v974_v49, %s757_s3 }
 0x100   : > { %392 = vrot.lane.b32.xlu0 %v986_v52, %s757_s3  ;;  %396 = vrot.lane.b32.xlu1 %v1018_v60, %s757_s3 }
 0x101   : > { %400 = vrot.lane.b32.xlu2 %v988_v53, %s757_s3 }
 0x108   : > { %402 = vrot.lane.b32.xlu0 %v1004_v57, %s757_s3  ;;  %404 = vrot.lane.b32.xlu1 %v1020_v61, %s757_s3 }
 0x109   : > { %406 = vrot.lane.b32.xlu2 %v980_v50, %s757_s3 }
 0x110   : > { %408 = vrot.lane.b32.xlu0 %v996_v54, %s757_s3  ;;  %410 = vrot.lane.b32.xlu1 %v1012_v58, %s757_s3 }
 0x111   : > { %412 = vrot.lane.b32.xlu2 %v1028_v62, %s757_s3 }
 0x118   : > { %414 = vrot.lane.b32.xlu0 %v982_v51, %s757_s3  ;;  %416 = vrot.lane.b32.xlu1 %v998_v55, %s757_s3 }
 0x119   : > { %418 = vrot.lane.b32.xlu2 %v1014_v59, %s757_s3 }
 0x120   : > { %420 = vrot.lane.b32.xlu0 %v1030_v63, %s757_s3 }
 0x153   : > { %v399_v0 = vpop.permute.xlu2 %398 }
 0x154   : > { %448 = vst.msk [vmem:[%s1290_s2 + $0x40] sm:$0xff] %vm443_vm2, %v399_v0 }
 0x15b   : > { %v401_v1 = vpop.permute.xlu2 %400 }
 0x15c   : > { %449 = vst.msk [vmem:[%s1290_s2 + $0x50] sm:$0xff] %vm443_vm2, %v401_v1 }
 0x163   : > { %v407_v2 = vpop.permute.xlu2 %406 }
 0x164   : > { %452 = vst.msk [vmem:[%s1290_s2 + $0x80] sm:$0xff] %vm443_vm2, %v407_v2 }
 0x16a   : > { %v391_v3 = vpop.permute.xlu0 %390  ;;  %v395_v4 = vpop.permute.xlu1 %394 }
 0x16b   : > { %444 = vst.msk [vmem:[%s1290_s2] sm:$0xff] %vm443_vm2, %v391_v3  ;;  %v413_v5 = vpop.permute.xlu2 %412 }
 0x16c   : > { %446 = vst.msk [vmem:[%s1290_s2 + $0x20] sm:$0xff] %vm443_vm2, %v395_v4 }
 0x16d   : > { %455 = vst.msk [vmem:[%s1290_s2 + $0xb0] sm:$0xff] %vm443_vm2, %v413_v5 }
 0x172   : > { %v393_v6 = vpop.permute.xlu0 %392  ;;  %v397_v7 = vpop.permute.xlu1 %396 }
 0x173   : > { %445 = vst.msk [vmem:[%s1290_s2 + $0x10] sm:$0xff] %vm443_vm2, %v393_v6  ;;  %v419_v8 = vpop.permute.xlu2 %418 }
 0x174   : > { %447 = vst.msk [vmem:[%s1290_s2 + $0x30] sm:$0xff] %vm443_vm2, %v397_v7 }
 0x175   : > { %458 = vst.msk [vmem:[%s1290_s2 + $0xe0] sm:$0xff] %vm443_vm2, %v419_v8 }
 0x17a   : > { %v403_v9 = vpop.permute.xlu0 %402  ;;  %v405_v10 = vpop.permute.xlu1 %404 }
 0x17b   : > { %450 = vst.msk [vmem:[%s1290_s2 + $0x60] sm:$0xff] %vm443_vm2, %v403_v9 }
 0x17c   : > { %451 = vst.msk [vmem:[%s1290_s2 + $0x70] sm:$0xff] %vm443_vm2, %v405_v10 }
 0x182   : > { %v409_v11 = vpop.permute.xlu0 %408  ;;  %v411_v12 = vpop.permute.xlu1 %410 }
 0x183   : > { %453 = vst.msk [vmem:[%s1290_s2 + $0x90] sm:$0xff] %vm443_vm2, %v409_v11 }
 0x184   : > { %454 = vst.msk [vmem:[%s1290_s2 + $0xa0] sm:$0xff] %vm443_vm2, %v411_v12 }
 0x18a   : > { %v415_v13 = vpop.permute.xlu0 %414  ;;  %v417_v14 = vpop.permute.xlu1 %416 }
 0x18b   : > { %456 = vst.msk [vmem:[%s1290_s2 + $0xc0] sm:$0xff] %vm443_vm2, %v415_v13 }
 0x18c   : > { %457 = vst.msk [vmem:[%s1290_s2 + $0xd0] sm:$0xff] %vm443_vm2, %v417_v14 }
 0x192   : > { %v421_v15 = vpop.permute.xlu0 %420 }
 0x193   : > { %459 = vst.msk [vmem:[%s1290_s2 + $0xf0] sm:$0xff] %vm443_vm2, %v421_v15 }
 0x194 PF: > { %p670_p8 = scmp.ne.s32.totalorder %s747_s9, 1 }
 0x196   : > { %463 = sbr.rel (%p670_p8) target bundleno = 427 (0x1ab), region = 40 }
 0x19b   : > { %469 = vst.msk [vmem:[%s1290_s2 + $0x8] sm:$0xff] %vm354_vm1, %v972_v48 }
 0x19c   : > { %470 = vst.msk [vmem:[%s1290_s2 + $0x18] sm:$0xff] %vm354_vm1, %v986_v52 }
 0x19d   : > { %471 = vst.msk [vmem:[%s1290_s2 + $0x28] sm:$0xff] %vm354_vm1, %v1002_v56 }
 0x19e   : > { %472 = vst.msk [vmem:[%s1290_s2 + $0x38] sm:$0xff] %vm354_vm1, %v1018_v60 }
 0x19f   : > { %473 = vst.msk [vmem:[%s1290_s2 + $0x48] sm:$0xff] %vm354_vm1, %v974_v49 }
 0x1a0   : > { %474 = vst.msk [vmem:[%s1290_s2 + $0x58] sm:$0xff] %vm354_vm1, %v988_v53 }
 0x1a1   : > { %475 = vst.msk [vmem:[%s1290_s2 + $0x68] sm:$0xff] %vm354_vm1, %v1004_v57 }
 0x1a2   : > { %476 = vst.msk [vmem:[%s1290_s2 + $0x78] sm:$0xff] %vm354_vm1, %v1020_v61 }
 0x1a3   : > { %477 = vst.msk [vmem:[%s1290_s2 + $0x88] sm:$0xff] %vm354_vm1, %v980_v50 }
 0x1a4   : > { %478 = vst.msk [vmem:[%s1290_s2 + $0x98] sm:$0xff] %vm354_vm1, %v996_v54 }
 0x1a5   : > { %479 = vst.msk [vmem:[%s1290_s2 + $0xa8] sm:$0xff] %vm354_vm1, %v1012_v58 }
 0x1a6   : > { %480 = vst.msk [vmem:[%s1290_s2 + $0xb8] sm:$0xff] %vm354_vm1, %v1028_v62 }
 0x1a7   : > { %481 = vst.msk [vmem:[%s1290_s2 + $0xc8] sm:$0xff] %vm354_vm1, %v982_v51 }
 0x1a8   : > { %482 = vst.msk [vmem:[%s1290_s2 + $0xd8] sm:$0xff] %vm354_vm1, %v998_v55 }
 0x1a9   : > { %483 = vst.msk [vmem:[%s1290_s2 + $0xe8] sm:$0xff] %vm354_vm1, %v1014_v59 }
 0x1aa   : > { %484 = vst.msk [vmem:[%s1290_s2 + $0xf8] sm:$0xff] %vm354_vm1, %v1030_v63 }
 0x1ab PF: > { %p671_p9 = scmp.ne.s32.totalorder %s747_s9, 2 }
 0x1ac   : > { %s758_s24 = smov (!%p671_p9), 64  }
 0x1ad   : > { %488 = sbr.rel (%p671_p9) target bundleno = 590 (0x24e), region = 44 }
 0x1b2   : > { %505 = vrot.lane.b32.xlu0 %v972_v48, %s758_s24  ;;  %509 = vrot.lane.b32.xlu1 %v1002_v56, %s758_s24  ;;  %vm558_vm3 = vcmask 1048064  }
 0x1b3   : > { %513 = vrot.lane.b32.xlu2 %v974_v49, %s758_s24 }
 0x1ba   : > { %507 = vrot.lane.b32.xlu0 %v986_v52, %s758_s24  ;;  %511 = vrot.lane.b32.xlu1 %v1018_v60, %s758_s24 }
 0x1bb   : > { %515 = vrot.lane.b32.xlu2 %v988_v53, %s758_s24 }
 0x1c2   : > { %517 = vrot.lane.b32.xlu0 %v1004_v57, %s758_s24  ;;  %519 = vrot.lane.b32.xlu1 %v1020_v61, %s758_s24 }
 0x1c3   : > { %521 = vrot.lane.b32.xlu2 %v980_v50, %s758_s24 }
 0x1ca   : > { %523 = vrot.lane.b32.xlu0 %v996_v54, %s758_s24  ;;  %525 = vrot.lane.b32.xlu1 %v1012_v58, %s758_s24 }
 0x1cb   : > { %527 = vrot.lane.b32.xlu2 %v1028_v62, %s758_s24 }
 0x1d2   : > { %529 = vrot.lane.b32.xlu0 %v982_v51, %s758_s24  ;;  %531 = vrot.lane.b32.xlu1 %v998_v55, %s758_s24 }
 0x1d3   : > { %533 = vrot.lane.b32.xlu2 %v1014_v59, %s758_s24 }
 0x1da   : > { %535 = vrot.lane.b32.xlu0 %v1030_v63, %s758_s24 }
 0x20d   : > { %v514_v16 = vpop.permute.xlu2 %513 }
 0x20e   : > { %563 = vst.msk [vmem:[%s1290_s2 + $0x48] sm:$0xff] %vm558_vm3, %v514_v16 }
 0x215   : > { %v516_v17 = vpop.permute.xlu2 %515 }
 0x216   : > { %564 = vst.msk [vmem:[%s1290_s2 + $0x58] sm:$0xff] %vm558_vm3, %v516_v17 }
 0x21d   : > { %v522_v18 = vpop.permute.xlu2 %521 }
 0x21e   : > { %567 = vst.msk [vmem:[%s1290_s2 + $0x88] sm:$0xff] %vm558_vm3, %v522_v18 }
 0x224   : > { %v506_v19 = vpop.permute.xlu0 %505  ;;  %v510_v20 = vpop.permute.xlu1 %509 }
 0x225   : > { %559 = vst.msk [vmem:[%s1290_s2 + $0x8] sm:$0xff] %vm558_vm3, %v506_v19  ;;  %v528_v21 = vpop.permute.xlu2 %527 }
 0x226   : > { %561 = vst.msk [vmem:[%s1290_s2 + $0x28] sm:$0xff] %vm558_vm3, %v510_v20 }
 0x227   : > { %570 = vst.msk [vmem:[%s1290_s2 + $0xb8] sm:$0xff] %vm558_vm3, %v528_v21 }
 0x22c   : > { %v508_v22 = vpop.permute.xlu0 %507  ;;  %v512_v23 = vpop.permute.xlu1 %511 }
 0x22d   : > { %560 = vst.msk [vmem:[%s1290_s2 + $0x18] sm:$0xff] %vm558_vm3, %v508_v22  ;;  %v534_v24 = vpop.permute.xlu2 %533 }
 0x22e   : > { %562 = vst.msk [vmem:[%s1290_s2 + $0x38] sm:$0xff] %vm558_vm3, %v512_v23 }
 0x22f   : > { %573 = vst.msk [vmem:[%s1290_s2 + $0xe8] sm:$0xff] %vm558_vm3, %v534_v24 }
 0x234   : > { %v518_v25 = vpop.permute.xlu0 %517  ;;  %v520_v26 = vpop.permute.xlu1 %519 }
 0x235   : > { %565 = vst.msk [vmem:[%s1290_s2 + $0x68] sm:$0xff] %vm558_vm3, %v518_v25 }
 0x236   : > { %566 = vst.msk [vmem:[%s1290_s2 + $0x78] sm:$0xff] %vm558_vm3, %v520_v26 }
 0x23c   : > { %v524_v27 = vpop.permute.xlu0 %523  ;;  %v526_v28 = vpop.permute.xlu1 %525 }
 0x23d   : > { %568 = vst.msk [vmem:[%s1290_s2 + $0x98] sm:$0xff] %vm558_vm3, %v524_v27 }
 0x23e   : > { %569 = vst.msk [vmem:[%s1290_s2 + $0xa8] sm:$0xff] %vm558_vm3, %v526_v28 }
 0x244   : > { %v530_v29 = vpop.permute.xlu0 %529  ;;  %v532_v30 = vpop.permute.xlu1 %531 }
 0x245   : > { %571 = vst.msk [vmem:[%s1290_s2 + $0xc8] sm:$0xff] %vm558_vm3, %v530_v29 }
 0x246   : > { %572 = vst.msk [vmem:[%s1290_s2 + $0xd8] sm:$0xff] %vm558_vm3, %v532_v30 }
 0x24c   : > { %v536_v31 = vpop.permute.xlu0 %535 }
 0x24d   : > { %574 = vst.msk [vmem:[%s1290_s2 + $0xf8] sm:$0xff] %vm558_vm3, %v536_v31 }
 0x24e PF: > { %s12_s11 = sadd.s32 1, %s755_s11   ;;  %s1291_s9 = smov %s751_s10 }
 0x24f   : > { %p9_p10 = scmp.ge.s32.totalorder %s12_s11, 5   ;;  %s1292_s10 = smov %s1294_s12 }
 0x251   :  { %11 = sbr.rel (!%p9_p10) target bundleno = 2 (0x2), region = 75 }

</bundles_post_ra>
